<compile_context>
chip_gen: v7x
topology: tpu7x:2x2x1
jax: 0.10.0
libtpu: 0.0.40
codegen_flags: <defaults>
</compile_context>

<pallas_src>
import jax
import jax.numpy as jnp
import numpy as np
from jax.experimental import pallas as pl
from jax.experimental.pallas import tpu as pltpu


def _make_kernel(H, W, L, Lp, D, TD, B, need_depth_pad, compute_dtype):
    # Per-term scale = (reference weight) / (reference element count); the mixed
    # second differences appear twice in the PyTorch loop, hence weight 2.
    c_dd = 1.0 / (B * (D - 2) * H * W)
    c_hh = 1.0 / (B * D * (H - 2) * W)
    c_ww = 1.0 / (B * D * H * (W - 2))
    c_dh = 2.0 / (B * (D - 1) * (H - 1) * W)
    c_dw = 2.0 / (B * (D - 1) * H * (W - 1))
    c_hw = 2.0 / (B * D * (H - 1) * (W - 1))

    def kernel(x_ref, m_ref, out_ref, carry_ref, acc_ref):
        # x_ref     : (1, TD, Lp)  current depth chunk, Lp = padded H*W on the lane axis
        # m_ref     : (5, Lp)      0/1 lane-validity masks [ww, hh, hw, dh, dw] (bf16)
        # out_ref   : (1, 1, 1)    per-batch scalar, written once on the last chunk
        # carry_ref : (2, Lp)      last two depth planes of the previous chunk
        # acc_ref   : (1, Lp)      per-lane f32 accumulator of the scaled squared sums
        c = pl.program_id(1)
        v = x_ref[0].astype(compute_dtype)            # (TD, Lp)
        first = v[0:1, :]

        @pl.when(c == 0)
        def _init():
            acc_ref[...] = jnp.zeros_like(acc_ref)
            # replicate the first plane so cross-chunk D-diffs start at exactly 0
            carry_ref[...] = jnp.broadcast_to(first, (2, Lp))

        def sq_fold(t):
            # Sum of squares over the depth (sublane) axis only -> (1, Lp) f32.
            # The expensive cross-lane reduction is deferred to the last chunk.
            t32 = t.astype(jnp.float32)
            return jnp.sum(t32 * t32, axis=0, keepdims=True)

        # ---- in-plane (H / W) second differences: 5 lane rolls on (TD, Lp) ----
        d1w = pltpu.roll(v, Lp - 1, 1) - v
        d1h = pltpu.roll(v, Lp - W, 1) - v
        dww = pltpu.roll(d1w, Lp - 1, 1) - d1w
        dhh = pltpu.roll(d1h, Lp - W, 1) - d1h
        dhw = pltpu.roll(d1h, Lp - 1, 1) - d1h

        part = (m_ref[0:1, :] * sq_fold(dww)) * c_ww \
             + (m_ref[1:2, :] * sq_fold(dhh)) * c_hh \
             + (m_ref[2:3, :] * sq_fold(dhw)) * c_hw

        # ---- depth-direction second differences (no extra big lane rolls:
        #      roll(d1d, k) - d1d == d1k[1:, :] - d1k[:-1, :]) ----
        # TODO(synk): the sublane-misaligned slices below (v[1:], d1h[1:], ...) may lower
        # to small relayout copies; audit with pl.lower_as_mlir if they show up hot.
        pp = carry_ref[...]
        d1d = v[1:, :] - v[:-1, :]                    # (TD-1, Lp)
        db0 = first - pp[1:2, :]                      # global d/dD at index base-1
        dbm1 = pp[1:2, :] - pp[0:1, :]                # global d/dD at index base-2

        ddh = d1h[1:, :] - d1h[:-1, :]                # (TD-1, Lp) mixed D,H
        ddw = d1w[1:, :] - d1w[:-1, :]                # (TD-1, Lp) mixed D,W
        ddd = d1d[1:, :] - d1d[:-1, :]                # (TD-2, Lp) pure D
        t_b2 = db0 - dbm1                             # global D 2nd-diff at base-2
        t_b1 = d1d[0:1, :] - db0                      # global D 2nd-diff at base-1
        bdh = pltpu.roll(db0, Lp - W, 1) - db0        # boundary mixed D,H   (1, Lp)
        bdw = pltpu.roll(db0, Lp - 1, 1) - db0        # boundary mixed D,W   (1, Lp)

        if need_depth_pad:
            # depth axis was zero-padded; mask rows whose upper plane lies past D
            base = c * TD
            r1 = jax.lax.broadcasted_iota(jnp.int32, (TD - 1, 1), 0)
            r2 = jax.lax.broadcasted_iota(jnp.int32, (TD - 2, 1), 0)
            md1 = (base + r1 + 1 <= D - 1).astype(compute_dtype)
            md2 = (base + r2 + 2 <= D - 1).astype(compute_dtype)
            ddh = ddh * md1
            ddw = ddw * md1
            ddd = ddd * md2
            tb1_ok = (c > 0) & (base <= D - 2)
        else:
            tb1_ok = c > 0

        part = part \
             + (m_ref[3:4, :] * (sq_fold(ddh) + sq_fold(bdh))) * c_dh \
             + (m_ref[4:5, :] * (sq_fold(ddw) + sq_fold(bdw))) * c_dw
        f_dd = sq_fold(ddd) + sq_fold(t_b2) + jnp.where(tb1_ok, sq_fold(t_b1), 0.0)
        part = part + f_dd * c_dd

        # carry the last two planes of this chunk to the next chunk
        carry_ref[...] = v[TD - 2:TD, :]
        acc_ref[...] = acc_ref[...] + part

        @pl.when(c == pl.num_programs(1) - 1)
        def _finalize():
            out_ref[...] = jnp.sum(acc_ref[...]).reshape(1, 1, 1)

    return kernel


def _lane_masks(H, W, L, Lp):
    lane = np.arange(Lp)
    w_idx = lane % W
    h_idx = lane // W
    valid = lane < L                                   # excludes zero-padded lanes
    m = np.zeros((5, Lp), np.float32)
    m[0] = (w_idx < W - 2) & valid                     # W,W
    m[1] = (h_idx < H - 2) & valid                     # H,H
    m[2] = (h_idx < H - 1) & (w_idx < W - 1) & valid   # H,W (== W,H)
    m[3] = (h_idx < H - 1) & valid                     # D,H (== H,D)
    m[4] = (w_idx < W - 1) & valid                     # D,W (== W,D)
    return m


def _vmem_capacity_bytes():
    try:
        cap = int(getattr(pltpu.get_tpu_info(), "vmem_capacity_bytes", 0))
        if cap > 0:
            return cap
    except Exception:
        pass
    return 128 * 2**20


def _pick_compute_dtype(in_dtype):
    """bf16 inputs keep the diff/roll stage in bf16 on v6e/v7x; v5e (no bf16 VPU) and
    all other input dtypes use f32."""
    if jnp.dtype(in_dtype) != jnp.dtype(jnp.bfloat16):
        return jnp.float32
    kind = ""
    try:
        kind = jax.devices()[0].device_kind.lower()
    except Exception:
        pass
    if "v5 lite" in kind or "v5e" in kind or "v5litepod" in kind:
        return jnp.float32
    return jnp.bfloat16


def _pick_depth_tile(D, Lp, in_itemsize, c_itemsize, budget_bytes):
    """Largest depth chunk whose estimated VMEM working set fits the budget.  Prefers a
    divisor of D (no padding); otherwise returns a multiple of 8 and the caller pads D."""
    per_plane = Lp * (2 * in_itemsize + 10 * c_itemsize + 8)   # dbl-buf input + temps
    fixed = Lp * (2 * c_itemsize + 4 + 4 * 5) + (1 << 16)      # carry + acc + masks
    max_td = int((budget_bytes - fixed) // per_plane)
    if max_td >= D:
        return D
    divisors = [t for t in range(8, max(max_td, 8) + 1, 8) if D % t == 0]
    if divisors:
        return max(divisors)
    return max(8, (max_td // 8) * 8)


def hessian_loss(img, hloss_weight=1.0, *, depth_tile=None, compute_dtype=None):
    """img: (N, C, D, H, W). Returns a float32 scalar equal to Hessian_Loss().forward(img)
    (HLoss_weight is never applied in the reference forward, so it is ignored)."""
    del hloss_weight
    N, C, D, H, W = img.shape
    if min(D, H, W) < 3:
        raise ValueError("hessian_loss requires D, H, W >= 3")
    B = N * C
    L = H * W
    Lp = -(-L // 128) * 128                          # lane axis padded to mult. of 128

    in_itemsize = jnp.dtype(img.dtype).itemsize
    if compute_dtype is None:
        compute_dtype = _pick_compute_dtype(img.dtype)
    c_itemsize = jnp.dtype(compute_dtype).itemsize

    vmem_cap = _vmem_capacity_bytes()                # 64 MiB/core on v7x, 128 on v5e/v6e
    vmem_ceiling = min(vmem_cap * 3 // 4, 80 * 2**20)

    if depth_tile is None:
        td = _pick_depth_tile(D, Lp, in_itemsize, c_itemsize, vmem_ceiling // 2)
    else:
        td = int(depth_tile)
        if td >= D:
            td = D
        elif td < 8 or td % 8 != 0:
            raise ValueError(f"depth_tile must be >= D or a multiple of 8, got {td}")
    D_pad = -(-D // td) * td
    dc = D_pad // td

    x = img.reshape(B, D, L)
    if D_pad != D or Lp != L:
        # zero padding: padded planes/lanes contribute exactly 0 to every in-plane term;
        # the depth-direction terms are gated in-kernel by row-validity masks.
        x = jnp.pad(x, ((0, 0), (0, D_pad - D), (0, Lp - L)))

    masks = jnp.asarray(_lane_masks(H, W, L, Lp), dtype=jnp.bfloat16)

    est = td * Lp * (2 * in_itemsize + 10 * c_itemsize + 8) \
        + Lp * (2 * c_itemsize + 4 + 2 * 2 * 5) + (1 << 16)
    vmem_limit = int(min(vmem_ceiling, max(32 * 2**20, 2 * est)))

    kernel = _make_kernel(H=H, W=W, L=L, Lp=Lp, D=D, TD=td, B=B,
                          need_depth_pad=(D_pad != D), compute_dtype=compute_dtype)

    # TODO(synk): when B == 1, add a second "parallel" grid axis over H row-bands (with a
    # 2-row halo) so both v7x TensorCores get work for single-volume calls.
    out = pl.pallas_call(
        kernel,
        out_shape=jax.ShapeDtypeStruct((B, 1, 1), jnp.float32),
        grid_spec=pltpu.PrefetchScalarGridSpec(
            num_scalar_prefetch=0,
            grid=(B, dc),
            in_specs=[
                pl.BlockSpec((1, td, Lp), lambda b, c: (b, c, 0)),
                pl.BlockSpec((5, Lp), lambda b, c: (0, 0)),
            ],
            out_specs=pl.BlockSpec((1, 1, 1), lambda b, c: (b, 0, 0)),
            scratch_shapes=[
                pltpu.VMEM((2, Lp), compute_dtype),   # carry: last two depth planes
                pltpu.VMEM((1, Lp), jnp.float32),     # per-lane accumulator
            ],
        ),
        compiler_params=pltpu.CompilerParams(
            dimension_semantics=("parallel", "arbitrary"),
            vmem_limit_bytes=vmem_limit,
        ),
    )(x, masks)

    return jnp.sum(out)


def _hessian_loss_ref(img):
    """Pure-JAX reference (mirrors the PyTorch forward)."""
    loss = 0.0
    x = img[:, :, 1:, :, :] - img[:, :, :-1, :, :]
    y = img[:, :, :, 1:, :] - img[:, :, :, :-1, :]
    z = img[:, :, :, :, 1:] - img[:, :, :, :, :-1]
    for tv in (x, y, z):
        h = tv[:, :, 1:, :, :] - tv[:, :, :-1, :, :]
        loss = loss + jnp.mean(jnp.square(h))
        h = tv[:, :, :, 1:, :] - tv[:, :, :, :-1, :]
        loss = loss + jnp.mean(jnp.square(h))
        h = tv[:, :, :, :, 1:] - tv[:, :, :, :, :-1]
        loss = loss + jnp.mean(jnp.square(h))
    return loss


if __name__ == "__main__":
    k1, k2, k3, k4 = jax.random.split(jax.random.PRNGKey(0), 4)

    # base case: chunked depth (exercises the carry scratch) and whole-depth path
    img = jax.random.normal(k1, (2, 3, 16, 16, 16), dtype=jnp.float32)
    ref = np.asarray(jax.block_until_ready(_hessian_loss_ref(img)))
    out = np.asarray(jax.block_until_ready(hessian_loss(img, depth_tile=8)))
    np.testing.assert_allclose(out, ref, rtol=1e-5, atol=1e-5)
    out = np.asarray(jax.block_until_ready(hessian_loss(img)))
    np.testing.assert_allclose(out, ref, rtol=1e-5, atol=1e-5)

    # ragged depth (D=11 with an 8-plane tile -> zero-padded tail chunk), H != W
    img2 = jax.random.normal(k2, (1, 2, 11, 8, 16), dtype=jnp.float32)
    ref2 = np.asarray(jax.block_until_ready(_hessian_loss_ref(img2)))
    out2 = np.asarray(jax.block_until_ready(hessian_loss(img2, depth_tile=8)))
    np.testing.assert_allclose(out2, ref2, rtol=1e-5, atol=1e-5)
    out2 = np.asarray(jax.block_until_ready(hessian_loss(img2)))
    np.testing.assert_allclose(out2, ref2, rtol=1e-5, atol=1e-5)

    # lane padding path: H*W = 121 is not a multiple of 128 (plus ragged depth)
    img3 = jax.random.normal(k3, (1, 1, 11, 11, 11), dtype=jnp.float32)
    ref3 = np.asarray(jax.block_until_ready(_hessian_loss_ref(img3)))
    out3 = np.asarray(jax.block_until_ready(hessian_loss(img3, depth_tile=8)))
    np.testing.assert_allclose(out3, ref3, rtol=1e-5, atol=1e-5)

    # bf16 inputs: diff stage stays bf16 (v6e/v7x), squares accumulate in f32
    img4 = jax.random.normal(k4, (2, 2, 12, 16, 16), dtype=jnp.float32).astype(jnp.bfloat16)
    ref4 = np.asarray(jax.block_until_ready(_hessian_loss_ref(img4.astype(jnp.float32))))
    out4 = np.asarray(jax.block_until_ready(hessian_loss(img4)))
    np.testing.assert_allclose(out4, ref4, rtol=5e-2, atol=1e-3)

    print("KERNEL_OK")
</pallas_src>

<mosaic_0001>
module attributes {stable_mosaic.version = 11 : i64} {
  func.func @kernel(%arg0: i32, %arg1: i32, %arg2: memref<1x8x256xf32, #tpu.memory_space<vmem>>, %arg3: memref<5x256xbf16, #tpu.memory_space<vmem>>, %arg4: memref<1x1x1xf32, #tpu.memory_space<vmem>>, %arg5: memref<2x256xf32, #tpu.memory_space<vmem>>, %arg6: memref<1x256xf32, #tpu.memory_space<vmem>>) attributes {dimension_semantics = [#tpu.dimension_semantics<parallel>, #tpu.dimension_semantics<arbitrary>], iteration_bounds = array<i64: 6, 2>, scalar_prefetch = 0 : i64, scratch_operands = 2 : i64, tpu.core_type = #tpu.core_type<tc>, window_params = [{transform_indices = @transform_0, window_bounds = array<i64: 1, 8, 256>}, {pipeline_mode = #tpu.pipeline_mode<synchronous>, transform_indices = @transform_1, window_bounds = array<i64: 5, 256>}, {transform_indices = @transform_2, window_bounds = array<i64: 1, 1, 1>}]} {
    %c0 = arith.constant 0 : index
    %c0_0 = arith.constant 0 : index
    %c0_1 = arith.constant 0 : index
    %0 = vector.load %arg2[%c0, %c0_0, %c0_1] : memref<1x8x256xf32, #tpu.memory_space<vmem>>, vector<1x8x256xf32>
    %1 = vector.shape_cast %0 : vector<1x8x256xf32> to vector<8x256xf32>
    %2 = vector.extract_strided_slice %1 {offsets = [0, 0], sizes = [1, 256], strides = [1, 1]} : vector<8x256xf32> to vector<1x256xf32>
    %c0_i32 = arith.constant 0 : i32
    %3 = arith.cmpi eq, %arg1, %c0_i32 : i32
    %4 = arith.extui %3 : i1 to i32
    %c0_i32_2 = arith.constant 0 : i32
    %5 = arith.cmpi ne, %4, %c0_i32_2 : i32
    scf.if %5 {
      %cst_40 = arith.constant 0.000000e+00 : f32
      %118 = vector.broadcast %cst_40 : f32 to vector<1x256xf32>
      %c0_41 = arith.constant 0 : index
      %c0_42 = arith.constant 0 : index
      %119 = vector.load %arg6[%c0_41, %c0_42] : memref<1x256xf32, #tpu.memory_space<vmem>>, vector<1x256xf32>
      tpu.vector_store %arg6[%c0_41, %c0_42], %118 {strides = array<i32>} : memref<1x256xf32, #tpu.memory_space<vmem>>, vector<1x256xf32>,
      %120 = vector.shape_cast %2 : vector<1x256xf32> to vector<1x256xf32>
      %121 = vector.broadcast %120 : vector<1x256xf32> to vector<2x256xf32>
      %c0_43 = arith.constant 0 : index
      %c0_44 = arith.constant 0 : index
      %122 = vector.load %arg5[%c0_43, %c0_44] : memref<2x256xf32, #tpu.memory_space<vmem>>, vector<2x256xf32>
      tpu.vector_store %arg5[%c0_43, %c0_44], %121 {strides = array<i32>} : memref<2x256xf32, #tpu.memory_space<vmem>>, vector<2x256xf32>,
    } else {
    }
    %c255_i32 = arith.constant 255 : i32
    %6 = tpu.dynamic_rotate %1 by %c255_i32 dim 1 : vector<8x256xf32>, i32 -> vector<8x256xf32>
    %7 = arith.subf %6, %1 : vector<8x256xf32>
    %c240_i32 = arith.constant 240 : i32
    %8 = tpu.dynamic_rotate %1 by %c240_i32 dim 1 : vector<8x256xf32>, i32 -> vector<8x256xf32>
    %9 = arith.subf %8, %1 : vector<8x256xf32>
    %c255_i32_3 = arith.constant 255 : i32
    %10 = tpu.dynamic_rotate %7 by %c255_i32_3 dim 1 : vector<8x256xf32>, i32 -> vector<8x256xf32>
    %11 = arith.subf %10, %7 : vector<8x256xf32>
    %c240_i32_4 = arith.constant 240 : i32
    %12 = tpu.dynamic_rotate %9 by %c240_i32_4 dim 1 : vector<8x256xf32>, i32 -> vector<8x256xf32>
    %13 = arith.subf %12, %9 : vector<8x256xf32>
    %c255_i32_5 = arith.constant 255 : i32
    %14 = tpu.dynamic_rotate %9 by %c255_i32_5 dim 1 : vector<8x256xf32>, i32 -> vector<8x256xf32>
    %15 = arith.subf %14, %9 : vector<8x256xf32>
    %c0_6 = arith.constant 0 : index
    %c0_7 = arith.constant 0 : index
    %16 = vector.load %arg3[%c0_6, %c0_7] : memref<5x256xbf16, #tpu.memory_space<vmem>>, vector<1x256xbf16>
    %17 = arith.mulf %11, %11 : vector<8x256xf32>
    %cst = arith.constant dense<0.000000e+00> : vector<256xf32>
    %18 = vector.multi_reduction <add>, %17, %cst [0] : vector<8x256xf32> to vector<256xf32>
    %19 = vector.shape_cast %18 : vector<256xf32> to vector<1x256xf32>
    %20 = arith.extf %16 : vector<1x256xbf16> to vector<1x256xf32>
    %21 = arith.mulf %20, %19 : vector<1x256xf32>
    %cst_8 = arith.constant 4.65029771E-5 : f32
    %22 = vector.broadcast %cst_8 : f32 to vector<1x256xf32>
    %23 = arith.mulf %21, %22 : vector<1x256xf32>
    %c1 = arith.constant 1 : index
    %c0_9 = arith.constant 0 : index
    %24 = vector.load %arg3[%c1, %c0_9] : memref<5x256xbf16, #tpu.memory_space<vmem>>, vector<1x256xbf16>
    %25 = arith.mulf %13, %13 : vector<8x256xf32>
    %cst_10 = arith.constant dense<0.000000e+00> : vector<256xf32>
    %26 = vector.multi_reduction <add>, %25, %cst_10 [0] : vector<8x256xf32> to vector<256xf32>
    %27 = vector.shape_cast %26 : vector<256xf32> to vector<1x256xf32>
    %28 = arith.extf %24 : vector<1x256xbf16> to vector<1x256xf32>
    %29 = arith.mulf %28, %27 : vector<1x256xf32>
    %cst_11 = arith.constant 4.65029771E-5 : f32
    %30 = vector.broadcast %cst_11 : f32 to vector<1x256xf32>
    %31 = arith.mulf %29, %30 : vector<1x256xf32>
    %32 = arith.addf %23, %31 : vector<1x256xf32>
    %c2 = arith.constant 2 : index
    %c0_12 = arith.constant 0 : index
    %33 = vector.load %arg3[%c2, %c0_12] : memref<5x256xbf16, #tpu.memory_space<vmem>>, vector<1x256xbf16>
    %34 = arith.mulf %15, %15 : vector<8x256xf32>
    %cst_13 = arith.constant dense<0.000000e+00> : vector<256xf32>
    %35 = vector.multi_reduction <add>, %34, %cst_13 [0] : vector<8x256xf32> to vector<256xf32>
    %36 = vector.shape_cast %35 : vector<256xf32> to vector<1x256xf32>
    %37 = arith.extf %33 : vector<1x256xbf16> to vector<1x256xf32>
    %38 = arith.mulf %37, %36 : vector<1x256xf32>
    %cst_14 = arith.constant 9.25925924E-5 : f32
    %39 = vector.broadcast %cst_14 : f32 to vector<1x256xf32>
    %40 = arith.mulf %38, %39 : vector<1x256xf32>
    %41 = arith.addf %32, %40 : vector<1x256xf32>
    %c0_15 = arith.constant 0 : index
    %c0_16 = arith.constant 0 : index
    %42 = vector.load %arg5[%c0_15, %c0_16] : memref<2x256xf32, #tpu.memory_space<vmem>>, vector<2x256xf32>
    %43 = vector.extract_strided_slice %1 {offsets = [1, 0], sizes = [7, 256], strides = [1, 1]} : vector<8x256xf32> to vector<7x256xf32>
    %44 = vector.extract_strided_slice %1 {offsets = [0, 0], sizes = [7, 256], strides = [1, 1]} : vector<8x256xf32> to vector<7x256xf32>
    %45 = arith.subf %43, %44 : vector<7x256xf32>
    %46 = vector.extract_strided_slice %42 {offsets = [1, 0], sizes = [1, 256], strides = [1, 1]} : vector<2x256xf32> to vector<1x256xf32>
    %47 = arith.subf %2, %46 : vector<1x256xf32>
    %48 = vector.extract_strided_slice %42 {offsets = [1, 0], sizes = [1, 256], strides = [1, 1]} : vector<2x256xf32> to vector<1x256xf32>
    %49 = vector.extract_strided_slice %42 {offsets = [0, 0], sizes = [1, 256], strides = [1, 1]} : vector<2x256xf32> to vector<1x256xf32>
    %50 = arith.subf %48, %49 : vector<1x256xf32>
    %51 = vector.extract_strided_slice %9 {offsets = [1, 0], sizes = [7, 256], strides = [1, 1]} : vector<8x256xf32> to vector<7x256xf32>
    %52 = vector.extract_strided_slice %9 {offsets = [0, 0], sizes = [7, 256], strides = [1, 1]} : vector<8x256xf32> to vector<7x256xf32>
    %53 = arith.subf %51, %52 : vector<7x256xf32>
    %54 = vector.extract_strided_slice %7 {offsets = [1, 0], sizes = [7, 256], strides = [1, 1]} : vector<8x256xf32> to vector<7x256xf32>
    %55 = vector.extract_strided_slice %7 {offsets = [0, 0], sizes = [7, 256], strides = [1, 1]} : vector<8x256xf32> to vector<7x256xf32>
    %56 = arith.subf %54, %55 : vector<7x256xf32>
    %57 = vector.extract_strided_slice %45 {offsets = [1, 0], sizes = [6, 256], strides = [1, 1]} : vector<7x256xf32> to vector<6x256xf32>
    %58 = vector.extract_strided_slice %45 {offsets = [0, 0], sizes = [6, 256], strides = [1, 1]} : vector<7x256xf32> to vector<6x256xf32>
    %59 = arith.subf %57, %58 : vector<6x256xf32>
    %60 = arith.subf %47, %50 : vector<1x256xf32>
    %61 = vector.extract_strided_slice %45 {offsets = [0, 0], sizes = [1, 256], strides = [1, 1]} : vector<7x256xf32> to vector<1x256xf32>
    %62 = arith.subf %61, %47 : vector<1x256xf32>
    %c240_i32_17 = arith.constant 240 : i32
    %63 = tpu.dynamic_rotate %47 by %c240_i32_17 dim 1 : vector<1x256xf32>, i32 -> vector<1x256xf32>
    %64 = arith.subf %63, %47 : vector<1x256xf32>
    %c255_i32_18 = arith.constant 255 : i32
    %65 = tpu.dynamic_rotate %47 by %c255_i32_18 dim 1 : vector<1x256xf32>, i32 -> vector<1x256xf32>
    %66 = arith.subf %65, %47 : vector<1x256xf32>
    %c0_i32_19 = arith.constant 0 : i32
    %67 = arith.cmpi sgt, %arg1, %c0_i32_19 : i32
    %c3 = arith.constant 3 : index
    %c0_20 = arith.constant 0 : index
    %68 = vector.load %arg3[%c3, %c0_20] : memref<5x256xbf16, #tpu.memory_space<vmem>>, vector<1x256xbf16>
    %69 = arith.mulf %53, %53 : vector<7x256xf32>
    %cst_21 = arith.constant dense<0.000000e+00> : vector<256xf32>
    %70 = vector.multi_reduction <add>, %69, %cst_21 [0] : vector<7x256xf32> to vector<256xf32>
    %71 = vector.shape_cast %70 : vector<256xf32> to vector<1x256xf32>
    %72 = arith.mulf %64, %64 : vector<1x256xf32>
    %cst_22 = arith.constant dense<0.000000e+00> : vector<256xf32>
    %73 = vector.multi_reduction <add>, %72, %cst_22 [0] : vector<1x256xf32> to vector<256xf32>
    %74 = vector.shape_cast %73 : vector<256xf32> to vector<1x256xf32>
    %75 = arith.addf %71, %74 : vector<1x256xf32>
    %76 = arith.extf %68 : vector<1x256xbf16> to vector<1x256xf32>
    %77 = arith.mulf %76, %75 : vector<1x256xf32>
    %cst_23 = arith.constant 9.25925924E-5 : f32
    %78 = vector.broadcast %cst_23 : f32 to vector<1x256xf32>
    %79 = arith.mulf %77, %78 : vector<1x256xf32>
    %80 = arith.addf %41, %79 : vector<1x256xf32>
    %c4 = arith.constant 4 : index
    %c0_24 = arith.constant 0 : index
    %81 = vector.load %arg3[%c4, %c0_24] : memref<5x256xbf16, #tpu.memory_space<vmem>>, vector<1x256xbf16>
    %82 = arith.mulf %56, %56 : vector<7x256xf32>
    %cst_25 = arith.constant dense<0.000000e+00> : vector<256xf32>
    %83 = vector.multi_reduction <add>, %82, %cst_25 [0] : vector<7x256xf32> to vector<256xf32>
    %84 = vector.shape_cast %83 : vector<256xf32> to vector<1x256xf32>
    %85 = arith.mulf %66, %66 : vector<1x256xf32>
    %cst_26 = arith.constant dense<0.000000e+00> : vector<256xf32>
    %86 = vector.multi_reduction <add>, %85, %cst_26 [0] : vector<1x256xf32> to vector<256xf32>
    %87 = vector.shape_cast %86 : vector<256xf32> to vector<1x256xf32>
    %88 = arith.addf %84, %87 : vector<1x256xf32>
    %89 = arith.extf %81 : vector<1x256xbf16> to vector<1x256xf32>
    %90 = arith.mulf %89, %88 : vector<1x256xf32>
    %cst_27 = arith.constant 9.25925924E-5 : f32
    %91 = vector.broadcast %cst_27 : f32 to vector<1x256xf32>
    %92 = arith.mulf %90, %91 : vector<1x256xf32>
    %93 = arith.addf %80, %92 : vector<1x256xf32>
    %94 = arith.mulf %59, %59 : vector<6x256xf32>
    %cst_28 = arith.constant dense<0.000000e+00> : vector<256xf32>
    %95 = vector.multi_reduction <add>, %94, %cst_28 [0] : vector<6x256xf32> to vector<256xf32>
    %96 = vector.shape_cast %95 : vector<256xf32> to vector<1x256xf32>
    %97 = arith.mulf %60, %60 : vector<1x256xf32>
    %cst_29 = arith.constant dense<0.000000e+00> : vector<256xf32>
    %98 = vector.multi_reduction <add>, %97, %cst_29 [0] : vector<1x256xf32> to vector<256xf32>
    %99 = vector.shape_cast %98 : vector<256xf32> to vector<1x256xf32>
    %100 = arith.addf %96, %99 : vector<1x256xf32>
    %101 = arith.mulf %62, %62 : vector<1x256xf32>
    %cst_30 = arith.constant dense<0.000000e+00> : vector<256xf32>
    %102 = vector.multi_reduction <add>, %101, %cst_30 [0] : vector<1x256xf32> to vector<256xf32>
    %103 = vector.shape_cast %102 : vector<256xf32> to vector<1x256xf32>
    %cst_31 = arith.constant 0.000000e+00 : f32
    %104 = vector.broadcast %cst_31 : f32 to vector<1x256xf32>
    %105 = arith.select %67, %103, %104 : vector<1x256xf32>
    %106 = arith.addf %100, %105 : vector<1x256xf32>
    %cst_32 = arith.constant 4.65029771E-5 : f32
    %107 = vector.broadcast %cst_32 : f32 to vector<1x256xf32>
    %108 = arith.mulf %106, %107 : vector<1x256xf32>
    %109 = arith.addf %93, %108 : vector<1x256xf32>
    %110 = vector.extract_strided_slice %1 {offsets = [6, 0], sizes = [2, 256], strides = [1, 1]} : vector<8x256xf32> to vector<2x256xf32>
    %c0_33 = arith.constant 0 : index
    %c0_34 = arith.constant 0 : index
    %111 = vector.load %arg5[%c0_33, %c0_34] : memref<2x256xf32, #tpu.memory_space<vmem>>, vector<2x256xf32>
    tpu.vector_store %arg5[%c0_33, %c0_34], %110 {strides = array<i32>} : memref<2x256xf32, #tpu.memory_space<vmem>>, vector<2x256xf32>,
    %c0_35 = arith.constant 0 : index
    %c0_36 = arith.constant 0 : index
    %112 = vector.load %arg6[%c0_35, %c0_36] : memref<1x256xf32, #tpu.memory_space<vmem>>, vector<1x256xf32>
    %113 = arith.addf %112, %109 : vector<1x256xf32>
    %c0_37 = arith.constant 0 : index
    %c0_38 = arith.constant 0 : index
    %114 = vector.load %arg6[%c0_37, %c0_38] : memref<1x256xf32, #tpu.memory_space<vmem>>, vector<1x256xf32>
    tpu.vector_store %arg6[%c0_37, %c0_38], %113 {strides = array<i32>} : memref<1x256xf32, #tpu.memory_space<vmem>>, vector<1x256xf32>,
    %c1_i32 = arith.constant 1 : i32
    %115 = arith.cmpi eq, %arg1, %c1_i32 : i32
    %116 = arith.extui %115 : i1 to i32
    %c0_i32_39 = arith.constant 0 : i32
    %117 = arith.cmpi ne, %116, %c0_i32_39 : i32
    scf.if %117 {
      %c0_40 = arith.constant 0 : index
      %c0_41 = arith.constant 0 : index
      %118 = vector.load %arg6[%c0_40, %c0_41] : memref<1x256xf32, #tpu.memory_space<vmem>>, vector<1x256xf32>
      %119 = vector.shape_cast %118 : vector<1x256xf32> to vector<1x1x256xf32>
      %cst_42 = arith.constant dense<0.000000e+00> : vector<1xf32>
      %120 = vector.multi_reduction <add>, %119, %cst_42 [1, 2] : vector<1x1x256xf32> to vector<1xf32>
      %121 = vector.shape_cast %120 : vector<1xf32> to vector<1x1x1xf32>
      %122 = vector.extract %121[0, 0, 0] : f32 from vector<1x1x1xf32>
      %123 = vector.broadcast %122 : f32 to vector<1x1x1xf32>
      %c0_43 = arith.constant 0 : index
      %c0_44 = arith.constant 0 : index
      %c0_45 = arith.constant 0 : index
      %124 = vector.load %arg4[%c0_43, %c0_44, %c0_45] : memref<1x1x1xf32, #tpu.memory_space<vmem>>, vector<1x1x1xf32>
      tpu.vector_store %arg4[%c0_43, %c0_44, %c0_45], %123 {strides = array<i32>} : memref<1x1x1xf32, #tpu.memory_space<vmem>>, vector<1x1x1xf32>,
    } else {
    }
    return
  }
  func.func @transform_0(%arg0: i32, %arg1: i32) -> (i32, i32, i32) {
    %c0_i32 = arith.constant 0 : i32
    %c0_i32_0 = arith.constant 0 : i32
    return %arg0, %arg1, %c0_i32 : i32, i32, i32
  }
  func.func @transform_1(%arg0: i32, %arg1: i32) -> (i32, i32) {
    %c0_i32 = arith.constant 0 : i32
    %c0_i32_0 = arith.constant 0 : i32
    %c0_i32_1 = arith.constant 0 : i32
    return %c0_i32, %c0_i32_0 : i32, i32
  }
  func.func @transform_2(%arg0: i32, %arg1: i32) -> (i32, i32, i32) {
    %c0_i32 = arith.constant 0 : i32
    %c0_i32_0 = arith.constant 0 : i32
    %c0_i32_1 = arith.constant 0 : i32
    return %arg0, %c0_i32, %c0_i32_0 : i32, i32, i32
  }
}

</mosaic_0001>

<bundles_post_ra>
// kernel: tpu_custom_call.1
= control target key start
LH: loop header
LB: loop body
LE: loop exit
PB: predicated region body
PF: predicated region fallthrough
CT: control target
= control target key end

     0   :  { %s1396_s0 = inlined_call_operand.hbm [shape: f32[6,16,256], index: 0, kind: input, shape index: {}]   ;;  %s1397_s1 = inlined_call_operand.hbm [shape: bf16[5,256], index: 1, kind: input, shape index: {}]   ;;  %s1398_s2 = inlined_call_operand.vmem [shape: f32[6,1,1], index: 2, kind: output, shape index: {}]  }
   0x1   :  { %1403 = sst [smem:[#allocation10_spill]] %s1397_s1 }
   0x2   :  { %7 = vsyncpa [#allocation5], 0 }
   0x3   :  { %9 = vsyncpa [#allocation5 + $0x1], 0 }
   0x4   :  { %10 = vsyncpa [#allocation7], 0  ;;  %s980_s9 = smov 0   ;;  %s982_s10 = smov 0  }
   0x5   :  { %s984_s11 = smov 0   ;;  %s986_s12 = smov 0  }
   0x6   :  { %s988_s13 = smov 0   ;;  %s990_s14 = smov 0  }
   0x7   :  { %s992_s15 = smov 0   ;;  %s994_s16 = smov 0  }
   0x8 LB: > { %s722_s17 = sadd.s32 4294967295, %s956_s16   ;;  %p50_p0 = scmp.ne.s32.totalorder %s932_s10, %s928_s9  ;;  %s956_s16 = sphi %s994_s16, %s16_s16   ;;  %s952_s15 = sphi %s992_s15, %s1422_s15   ;;  %s948_s14 = sphi %s990_s14, %s1421_s14   ;;  %s944_s13 = sphi %s988_s13, %s1420_s13   ;;  %s940_s12 = sphi %s986_s12, %s1419_s12   ;;  %s936_s11 = sphi %s984_s11, %s1418_s11   ;;  %s932_s10 = sphi %s982_s10, %s1417_s10   ;;  %s928_s9 = sphi %s980_s9, %s1416_s9  }
   0x9   : > { %p1020_p1 = scmp.eq.s32.totalorder %s722_s17, 0  ;;  %p724_p2 = scmp.ge.s32.totalorder %s956_s16, 1 }
   0xa   : > { %p108_p3 = scmp.lt.s32.totalorder %s956_s16, 13  ;;  %s958_s21 = smov [#allocation6]  }
   0xb   : > { %s1404_s18 = scalar_select %p1020_p1, 1, 0 }
   0xc   : > { %p1028_p4 = por %p1020_p1, %p50_p0  ;;  %p1032_p5 = pnand %p724_p2, %p108_p3 }
   0xd   : > { %s121_s22 = sshll.u32 %s958_s21, 4  ;;  %s25_s24 = sadd.s32 1, %s948_s14  ;;  %s122_s22 = int_to_ptr.vmem [resolvable:$true] %s121_s22 }
   0xe   : > { %s1405_s19 = scalar_select %p1028_p4, 1, 0 }
   0xf   : > { %s1406_s20 = scalar_select %p1032_p5, 1, 0 }
  0x10   : > { %p747_p6 = pneg %p1032_p5  ;;  %s1408_s1 = sld [smem:[#allocation10_spill]] }
  0x12   : > { %p1040_p7 = pnand %p747_p6, %p1020_p1 }
  0x14   : > { %p830_p9 = pneg %p1040_p7 }
  0x16   : > { %s828_s27 = scalar_lea.hbm %s1408_s1, 128 }
  0x17   : > { %p829_p8 = scmp.ne.s32.totalorder %s1408_s1, %s828_s27  ;;  %p835_p12 = scmp.lt.u32.totalorder %s828_s27, %s1408_s1 }
  0x19   : > { %p831_p10 = pnand %p830_p9, %p829_p8 }
  0x1b   : > { %p832_p11 = pneg %p831_p10 }
  0x1d   : > { %p837_p13 = pnand %p835_p12, %p832_p11 }
  0x1f   : > { %840 = shalt.err (!%p837_p13)
}
  0x20   : > { %s841_s4 = scalar_lea.vmem %s122_s22, 128  ;;  %p849_p6 = scmp.lt.s32.totalorder %s122_s22, %s122_s22 }
  0x21   : > { %p842_p0 = scmp.ne.s32.totalorder %s122_s22, %s841_s4  ;;  %p850_p1 = scmp.lt.s32.totalorder %s841_s4, %s841_s4 }
  0x23   : > { %p844_p2 = pnand %p842_p0, %p830_p9  ;;  %p851_p4 = por %p850_p1, %p849_p6 }
  0x25   : > { %p845_p3 = pneg %p844_p2 }
  0x27   : > { %p852_p5 = pnand %p851_p4, %p845_p3 }
  0x29   : > { %855 = shalt.err (!%p852_p5)
}
  0x2a   : > { %750 = dma.hbm_to_vmem [thread:$0]  (!%p1040_p7), %s1408_s1, 128, %s122_s22, [#allocation7]  }
  0x2b   : > { %p26_p8 = scmp.ge.s32.totalorder %s25_s24, 2  ;;  %s28_s7 = sadd.s32 1, %s952_s15 }
  0x2c   : > { %s37_s8 = sadd.s32 1, %s936_s11  ;;  %p44_p1 = scmp.ne.s32.totalorder %s936_s11, %s932_s10 }
  0x2d   : > { %s1424_s24 = smov (%p26_p8, %s25_s24), 0  ;;  %s1426_s7 = smov (!%p26_p8, %s28_s7), %s952_s15 }
  0x2e   : > { %s33_s9 = ssub.s32 %s948_s14, %s1424_s24  ;;  %p45_p4 = scmp.eq.s32.totalorder %s956_s16, 0 }
  0x2f   : > { %p30_p5 = scmp.ge.s32.totalorder %s1426_s7, 6  ;;  %p756_p9 = scmp.lt.s32.totalorder %s956_s16, 12 }
  0x30   : > { %p1072_p10 = por %p45_p4, %p44_p1  ;;  %s132_s21 = sand.u32 1, %s936_s11  }
  0x31   : > { %s1428_s7 = smov (%p30_p5, %s1426_s7), 0  ;;  %s727_s22 = sshll.u32 %s132_s21, 4 }
  0x32   : > { %s32_s23 = ssub.s32 %s952_s15, %s1428_s7  ;;  %s728_s26 = sshll.u32 %s948_s14, 1 }
  0x33   : > { %s34_s25 = sor.u32 %s33_s9, %s32_s23  ;;  %s729_s27 = sshll.u32 %s952_s15, 2 }
  0x34   : > { %p35_p7 = scmp.eq.s32.totalorder %s34_s25, 0  ;;  %s142_s28 = sadd.s32 %s729_s27, %s728_s26 }
  0x35   : > { %s136_s29 = scalar_lea.vmem [#allocation4], %s727_s22  ;;  %s730_s4 = sshll.u32 %s142_s28, 7 }
  0x36   : > { %s146_s30 = sshll.u32 %s136_s29, 4  ;;  %s1091_s1 = scalar_lea.hbm %s1396_s0, %s730_s4  ;;  %s1086_s30 = int_to_ptr.vmem [resolvable:$true] %s146_s30 }
  0x37   : > { %s1084_s3 = scalar_select %p35_p7, %s936_s11, %s37_s8  }
  0x38   : > { %p1097_p11 = pnand %p756_p9, %p1072_p10  ;;  %s133_s8 = scalar_lea.sflag [#allocation5], %s132_s21 }
  0x39   : > { %s856_s22 = scalar_lea.hbm %s1091_s1, 256  ;;  %s861_s25 = scalar_lea.hbm %s1396_s0, 3072 }
  0x3a   : > { %p857_p12 = scmp.ne.s32.totalorder %s1091_s1, %s856_s22  ;;  %p858_p13 = pneg %p1097_p11 }
  0x3b   : > { %p862_p3 = scmp.lt.u32.totalorder %s1091_s1, %s1396_s0  ;;  %p863_p6 = scmp.lt.u32.totalorder %s861_s25, %s856_s22 }
  0x3c   : > { %p859_p0 = pnand %p858_p13, %p857_p12  ;;  %p865_p1 = scmp.lt.u32.totalorder %s856_s22, %s1091_s1 }
  0x3d   : > { %p864_p8 = por %p863_p6, %p862_p3 }
  0x3e   : > { %p860_p2 = pneg %p859_p0 }
  0x3f   : > { %p866_p4 = por %p865_p1, %p864_p8 }
  0x41   : > { %p867_p5 = pnand %p866_p4, %p860_p2 }
  0x43   : > { %870 = shalt.err (!%p867_p5)
}
  0x44   : > { %s871_s21 = scalar_lea.vmem %s1086_s30, 256  ;;  %s959_s28 = smov [#allocation4]  }
  0x45   : > { %p872_p9 = scmp.ne.s32.totalorder %s1086_s30, %s871_s21  ;;  %s876_s29 = sshll.u32 %s959_s28, 4  ;;  %s877_s29 = int_to_ptr.vmem [resolvable:$false] %s876_s29 }
  0x46   : > { %s878_s4 = scalar_lea.vmem %s877_s29, 512  ;;  %p879_p12 = scmp.lt.s32.totalorder %s1086_s30, %s877_s29 }
  0x47   : > { %p874_p10 = pnand %p872_p9, %p858_p13  ;;  %p880_p0 = scmp.lt.s32.totalorder %s878_s4, %s871_s21 }
  0x49   : > { %p875_p7 = pneg %p874_p10  ;;  %p881_p3 = por %p880_p0, %p879_p12 }
  0x4b   : > { %p882_p6 = pnand %p881_p3, %p875_p7 }
  0x4d   : > { %885 = shalt.err (!%p882_p6)
}
  0x4e   : > { %754 = dma.hbm_to_vmem [thread:$0]  (!%p1097_p11), %s1091_s1, 256, %s1086_s30, %s133_s8  }
  0x4f   : > { %p1411_p2 = scmp.ne.s32.totalorder %s1406_s20, 0 }
  0x50   : > { %s157_s5 = sand.u32 (!%p1411_p2), 1, %s932_s10   ;;  %p1412_p13 = scmp.ne.s32.totalorder (!%p1411_p2), %s1405_s19, 0 }
  0x51   : > { %155 = sbr.rel (%p1411_p2) target bundleno = 612 (0x264), region = 28  ;;  %s732_s6 = sshll.u32 (!%p1411_p2), %s157_s5, 4 }
  0x52   : > { %s158_s22 = scalar_lea.sflag (!%p1411_p2), [#allocation5], %s157_s5  ;;  %s161_s17 = scalar_lea.vmem (!%p1411_p2), [#allocation4], %s732_s6 }
  0x58   : > { %919 = dma.done.wait (%p1412_p13), %s158_s22, 256  }
  0x59   : > { %921 = vsyncadd (%p1412_p13), %s158_s22, 4294967040  ;;  %p1413_p8 = scmp.ne.s32.totalorder %s1404_s18, 0 }
  0x5b   : > { %923 = dma.done.wait (%p1413_p8), [#allocation7], 128  }
  0x5c   : > { %925 = vsyncadd (%p1413_p8), [#allocation7], 4294967168  ;;  %p184_p11 = scmp.lt.s32.totalorder %s944_s13, 5  ;;  %v1145_v0 = vld [vmem:[%s161_s17] sm:$0xff]  ;;  %v1147_v1 = vld [vmem:[%s161_s17 + $0x8] sm:$0xff]  ;;  %p734_p1 = scmp.ne.s32.totalorder %s940_s12, 0 }
  0x5d   : > { %v193_v2 = vlaneseq (!%p734_p1)  ;;  %v960_v4 = vmov (!%p734_p1), 0.0  }
  0x5e   : > { %s1430_s13 = smov (!%p184_p11, %s944_s13), 5  ;;  %192 = sbr.rel (%p734_p1) target bundleno = 104 (0x68), region = 40 }
  0x5f   : > { %s186_s30 = scalar_lea.vmem %s1398_s2, %s1430_s13  ;;  %vm195_vm0 = vcmp.lt.s32.totalorder (!%p734_p1), %v193_v2, 256  ;;  %v199_v3 = vshrl.u32 (!%p734_p1), %v193_v2, 7 }
  0x60   : > { %197 = vst.msk [vmem:[#allocation3] sm:$0x3] (!%p734_p1), %vm195_vm0, %v960_v4 }
  0x61   : > { %v200_v5 = vsub.s32 (!%p734_p1), 0, %v199_v3 }
  0x63   : > { %v201_v6 = vrot.slane (!%p734_p1), %v1145_v0, %v200_v5  ;;  %v205_v7 = vrot.slane (!%p734_p1), %v1147_v1, %v200_v5 }
  0x65   : > { %v208_v8 = vcombine.low %v201_v6, %v205_v7 }
  0x67   : > { %735 = vst.sshfl [vmem:[#allocation2] sm:$0x33 pattern:$0x76325410] %v208_v8 }
  0x68 PF: > { %s961_s18 = smov 112   ;;  %s962_s19 = smov 127   ;;  %v963_v9 = vmov 1983009808   ;;  %v222_v11 = vlaneseq  ;;  %v571_v12 = vcombine.high %v1145_v0, %v1147_v1  ;;  %v341_v38 = vrot.slane %v1145_v0, 7 }
  0x69   : > { %229 = vrot.lane.b32.xlu0 %v1145_v0, %s961_s18  ;;  %218 = vrot.lane.b32.xlu1 %v1145_v0, %s962_s19  ;;  %v573_v10 = vunpack.c.l.s4 %v963_v9  ;;  %v342_v46 = vrot.slane %v1147_v1, 7  ;;  %vm433_vm3 = vcmask 1046528   ;;  %vm529_vm4 = vcmask 1045504   ;;  %p424_p4 = scmp.gt.s32.totalorder %s940_s12, 0  ;;  %p736_p5 = scmp.ne.s32.totalorder %s940_s12, 1 }
  0x6a   : > { %v1159_v14 = vshrl.u32 %v222_v11, 7  ;;  %v1169_v19 = vand.u32 127, %v222_v11  ;;  %v1234_v43 = vsub.f32 %v1145_v0, %v341_v38  ;;  %vm604_vm6 = vcmp.lt.s32.totalorder %v222_v11, 256 }
  0x6b   : > { %v574_v13 = vunpack.c.0.s8 %v573_v10  ;;  %v1243_v52 = vsub.f32 %v1147_v1, %v342_v46  ;;  %s1286_s9 = scalar_select %p424_p4, 1, 0 }
  0x6c   : > { %vm233_vm1 = vcmp.lt.s32.totalorder %v1169_v19, 112  ;;  %vm224_vm2 = vcmp.lt.s32.totalorder %v1169_v19, 127  ;;  %v354_v30 = vsub.s32 3, %v1159_v14  ;;  %v1193_v31 = vsub.s32 1, %v1159_v14 }
  0x6d   : > { %231 = vrot.lane.b32.xlu0 %v1147_v1, %s961_s18  ;;  %220 = vrot.lane.b32.xlu1 %v1147_v1, %s962_s19  ;;  %v577_v15 = vsub.s32 %v574_v13, %v1159_v14  ;;  %v381_v49 = vrot.slane %v1234_v43, 7  ;;  %v382_v58 = vrot.slane %v1243_v52, 7  ;;  %vm623_vm7 = vcmask (!%p736_p5), 1040384  }
  0x6e   : > { %v1166_v18 = vld [vmem:[#allocation2] sm:$0xf]  ;;  %vm637_vm8 = vcmask (!%p736_p5), 0  }
  0x6f   : > { %v578_v16 = vrot.slane %v571_v12, %v577_v15  ;;  %v355_v34 = vrot.slane %v1166_v18, %v354_v30  ;;  %v351_v35 = vrot.slane %v1166_v18, %v1193_v31  ;;  %v385_v55 = vsub.f32 %v1234_v43, %v381_v49 }
  0x70   : > { %v360_v6 = vrot.slane %v1166_v18, 7 }
  0x71   : > { %v579_v17 = vcombine.high %v578_v16, %v578_v16  ;;  %v1215_v36 = vsub.f32 %v1147_v1, %v355_v34  ;;  %v1218_v37 = vsub.f32 %v1145_v0, %v351_v35  ;;  %v521_v61 = vmul.f32 %v385_v55, %v385_v55 }
  0x72   : > { %v362_v15 = vsub.f32 %v1166_v18, %v360_v6 }
  0x73   : > { %581 = vst [vmem:[#allocation2] sm:$0xf] %v579_v17  ;;  %v525_v4 = vrot.slane %v521_v61, 2 }
  0x74   : > { %v395_v18 = vrot.slane %v362_v15, %v354_v30 }
  0x75   : > { %v530_v12 = vsel %vm529_vm4, %v525_v4, 0.0 }
  0xdb   : > { %v230_v20 = vpop.permute.xlu0 %229  ;;  %v219_v21 = vpop.permute.xlu1 %218 }
  0xdf   : > { %v232_v22 = vpop.permute.xlu0 %231  ;;  %v221_v23 = vpop.permute.xlu1 %220 }
  0xe0   : > { %v234_v24 = vsel %vm233_vm1, %v230_v20, %v232_v22  ;;  %v235_v25 = vsel %vm233_vm1, %v232_v22, %v230_v20  ;;  %v225_v28 = vsel %vm224_vm2, %v219_v21, %v221_v23  ;;  %v226_v29 = vsel %vm224_vm2, %v221_v23, %v219_v21 }
  0xe1   : > { %v1178_v26 = vsub.f32 %v234_v24, %v1145_v0  ;;  %v1181_v27 = vsub.f32 %v235_v25, %v1147_v1  ;;  %v1196_v32 = vsub.f32 %v225_v28, %v1145_v0  ;;  %v1199_v33 = vsub.f32 %v226_v29, %v1147_v1  ;;  %v1251_v24 = vld [vmem:[#allocation6] sm:$0x11]  ;;  %v1254_v28 = vld [vmem:[#allocation6] sm:$0x22] }
  0xe2   : > { %v386_v0 = vsub.f32 %v1243_v52, %v382_v58  ;;  %v531_v20 = vrot.slane %v530_v12, 4  ;;  %v391_v25 = vrot.slane %v362_v15, %v1193_v31  ;;  %v278_v46 = vunpack.c.h.bf16 %v1251_v24 }
  0xe3   : > { %246 = vrot.lane.b32.xlu0 %v1178_v26, %s961_s18  ;;  %248 = vrot.lane.b32.xlu1 %v1181_v27, %s961_s18  ;;  %v365_v39 = vrot.slane %v1178_v26, 7  ;;  %v373_v40 = vrot.slane %v1196_v32, 7  ;;  %v374_v41 = vrot.slane %v1199_v33, 7  ;;  %v366_v42 = vrot.slane %v1181_v27, 7 }
  0xe4   : > { %v522_v10 = vmul.f32 %v386_v0, %v386_v0  ;;  %v532_v35 = vadd.f32 %v531_v20, %v530_v12  ;;  %v398_v49 = vsub.f32 %v1218_v37, %v391_v25 }
  0xe5   : > { %v369_v44 = vsub.f32 %v1178_v26, %v365_v39  ;;  %v377_v45 = vsub.f32 %v1196_v32, %v373_v40  ;;  %v378_v47 = vsub.f32 %v1199_v33, %v374_v41  ;;  %v370_v48 = vsub.f32 %v1181_v27, %v366_v42 }
  0xe6   : > { %v526_v22 = vrot.slane %v522_v10, 2  ;;  %v402_v39 = vrot.slane %v1218_v37, 7  ;;  %v277_v41 = vunpack.c.l.bf16 %v1251_v24  ;;  %v403_v42 = vrot.slane %v1215_v36, 7 }
  0xe7   : > { %240 = vrot.lane.b32.xlu1 %v1199_v33, %s962_s19  ;;  %238 = vrot.lane.b32.xlu0 %v1196_v32, %s962_s19  ;;  %v425_v50 = vmul.f32 %v369_v44, %v369_v44  ;;  %v473_v51 = vmul.f32 %v377_v45, %v377_v45  ;;  %v474_v53 = vmul.f32 %v378_v47, %v378_v47  ;;  %v1262_v44 = vld [vmem:[#allocation6] sm:$0x44]  ;;  %v324_v47 = vunpack.c.l.bf16 %v1254_v28 }
  0xe8   : > { %v426_v54 = vmul.f32 %v370_v48, %v370_v48  ;;  %v537_v40 = vsel %vm529_vm4, %v526_v22, 0.0  ;;  %v325_v48 = vunpack.c.h.bf16 %v1254_v28  ;;  %v406_v58 = vsub.f32 %v1234_v43, %v402_v39 }
  0xe9   : > { %v429_v56 = vrot.slane %v425_v50, 1  ;;  %v477_v57 = vrot.slane %v473_v51, 1  ;;  %v478_v59 = vrot.slane %v474_v53, 1  ;;  %v533_v51 = vrot.slane %v532_v35, 2 }
  0xea   : > { %v430_v60 = vrot.slane %v426_v54, 1  ;;  %v538_v53 = vrot.slane %v537_v40, 4 }
  0xeb   : > { %256 = vrot.lane.b32.xlu1 %v1181_v27, %s962_s19  ;;  %254 = vrot.lane.b32.xlu0 %v1178_v26, %s962_s19  ;;  %v434_v62 = vsel %vm433_vm3, %v429_v56, 0.0  ;;  %v481_v63 = vsel %vm433_vm3, %v477_v57, 0.0  ;;  %v488_v1 = vsel %vm433_vm3, %v478_v59, 0.0  ;;  %v399_v57 = vsub.f32 %v1215_v36, %v395_v18 }
  0xec   : > { %v435_v2 = vrot.slane %v434_v62, 4  ;;  %v441_v3 = vsel %vm433_vm3, %v430_v60, 0.0  ;;  %v482_v5 = vrot.slane %v481_v63, 4  ;;  %v489_v8 = vrot.slane %v488_v1, 4 }
  0xed   : > { %v442_v7 = vrot.slane %v441_v3, 4  ;;  %v501_v59 = vunpack.c.l.bf16 %v1262_v44  ;;  %v539_v6 = vadd.f32 %v538_v53, %v537_v40  ;;  %v1290_v12 = vmul.f32 %v399_v57, %v399_v57 }
  0xee   : > { %v436_v9 = vadd.f32 %v435_v2, %v434_v62  ;;  %v483_v13 = vadd.f32 %v482_v5, %v481_v63  ;;  %v490_v17 = vadd.f32 %v489_v8, %v488_v1  ;;  %v407_v62 = vsub.f32 %v1243_v52, %v403_v42 }
  0xef   : > { %410 = vrot.lane.b32.xlu1 %v1215_v36, %s961_s18  ;;  %408 = vrot.lane.b32.xlu0 %v1218_v37, %s961_s18  ;;  %v443_v16 = vadd.f32 %v442_v7, %v441_v3  ;;  %v502_v3 = vunpack.c.h.bf16 %v1262_v44  ;;  %v1280_v1 = vmul.f32 %v398_v49, %v398_v49  ;;  %v1282_v5 = vadd.f32 %v533_v51, %v532_v35 }
  0xf0   : > { %v437_v21 = vrot.slane %v436_v9, 2  ;;  %v484_v23 = vrot.slane %v483_v13, 2  ;;  %v491_v34 = vrot.slane %v490_v17, 2  ;;  %v555_v35 = vstv %s1286_s9 }
  0xf1   : > { %v444_v29 = vrot.slane %v443_v16, 2  ;;  %vm1314_vm5 = vcmp.eq.s32.totalorder %v555_v35, 1 }
  0xf2   : > { %v438_v38 = vadd.f32 %v437_v21, %v436_v9  ;;  %v485_v45 = vadd.f32 %v484_v23, %v483_v13  ;;  %v492_v50 = vadd.f32 %v491_v34, %v490_v17  ;;  %v1298_v17 = vmul.f32 %v406_v58, %v406_v58 }
  0xf3   : > { %418 = vrot.lane.b32.xlu1 %v1215_v36, %s962_s19  ;;  %416 = vrot.lane.b32.xlu0 %v1218_v37, %s962_s19  ;;  %v445_v30 = vadd.f32 %v444_v29, %v443_v16  ;;  %v540_v34 = vrot.slane %v539_v6, 2 }
  0xf4   : > { %v439_v56 = vrot.slane %v438_v38, 1  ;;  %v486_v63 = vrot.slane %v485_v45, 1  ;;  %v493_v4 = vrot.slane %v492_v50, 1 }
  0xf5   : > { %v446_v43 = vrot.slane %v445_v30, 1  ;;  %v541_v57 = vadd.f32 %v540_v34, %v539_v6 }
  0xf6   : > { %v1288_v10 = vadd.f32 %v439_v56, %v438_v38  ;;  %v1296_v16 = vadd.f32 %v486_v63, %v485_v45  ;;  %v1302_v29 = vadd.f32 %v493_v4, %v492_v50 }
  0xf7   : > { %v447_v25 = vadd.f32 %v446_v43, %v445_v30 }
 0x155   : > { %v247_v54 = vpop.permute.xlu0 %246  ;;  %v249_v55 = vpop.permute.xlu1 %248 }
 0x156   : > { %v250_v60 = vsel %vm233_vm1, %v247_v54, %v249_v55  ;;  %v251_v61 = vsel %vm233_vm1, %v249_v55, %v247_v54 }
 0x157   : > { %v252_v0 = vsub.f32 %v250_v60, %v1178_v26  ;;  %v253_v2 = vsub.f32 %v251_v61, %v1181_v27 }
 0x159   : > { %v283_v7 = vmul.f32 %v252_v0, %v252_v0  ;;  %v284_v8 = vmul.f32 %v253_v2, %v253_v2  ;;  %v239_v52 = vpop.permute.xlu0 %238  ;;  %v241_v9 = vpop.permute.xlu1 %240 }
 0x15a   : > { %v242_v13 = vsel %vm224_vm2, %v239_v52, %v241_v9  ;;  %v243_v15 = vsel %vm224_vm2, %v241_v9, %v239_v52 }
 0x15b   : > { %v285_v20 = vrot.slane %v283_v7, 4  ;;  %v291_v21 = vrot.slane %v284_v8, 4  ;;  %v244_v22 = vsub.f32 %v242_v13, %v1196_v32  ;;  %v245_v23 = vsub.f32 %v243_v15, %v1199_v33 }
 0x15c   : > { %v535_v32 = vrot.slane %v1282_v5, 1  ;;  %v1310_v33 = vmul.f32 %v407_v62, %v407_v62 }
 0x15d   : > { %v286_v38 = vadd.f32 %v285_v20, %v283_v7  ;;  %v292_v18 = vadd.f32 %v291_v21, %v284_v8  ;;  %v263_v39 = vmul.f32 %v244_v22, %v244_v22  ;;  %v264_v40 = vmul.f32 %v245_v23, %v245_v23  ;;  %v255_v42 = vpop.permute.xlu0 %254  ;;  %v257_v45 = vpop.permute.xlu1 %256 }
 0x15e   : > { %v258_v49 = vsel %vm224_vm2, %v255_v42, %v257_v45  ;;  %v259_v51 = vsel %vm224_vm2, %v257_v45, %v255_v42  ;;  %v536_v45 = vadd.f32 %v535_v32, %v1282_v5 }
 0x15f   : > { %v287_v30 = vrot.slane %v286_v38, 2  ;;  %v293_v50 = vrot.slane %v292_v18, 2  ;;  %v265_v53 = vrot.slane %v263_v39, 4  ;;  %v271_v54 = vrot.slane %v264_v40, 4 }
 0x160   : > { %v260_v55 = vsub.f32 %v258_v49, %v1178_v26  ;;  %v261_v56 = vsub.f32 %v259_v51, %v1181_v27 }
 0x161   : > { %v288_v60 = vadd.f32 %v287_v30, %v286_v38  ;;  %v294_v61 = vadd.f32 %v293_v50, %v292_v18  ;;  %v266_v63 = vadd.f32 %v265_v53, %v263_v39  ;;  %v272_v0 = vadd.f32 %v271_v54, %v264_v40  ;;  %v409_v2 = vpop.permute.xlu0 %408  ;;  %v411_v62 = vpop.permute.xlu1 %410 }
 0x162   : > { %v310_v43 = vmul.f32 %v260_v55, %v260_v55  ;;  %v311_v4 = vmul.f32 %v261_v56, %v261_v56  ;;  %v412_v7 = vsel %vm233_vm1, %v409_v2, %v411_v62  ;;  %v413_v26 = vsel %vm233_vm1, %v411_v62, %v409_v2 }
 0x163   : > { %v289_v27 = vrot.slane %v288_v60, 1  ;;  %v295_v6 = vrot.slane %v294_v61, 1  ;;  %v267_v8 = vrot.slane %v266_v63, 2  ;;  %v273_v52 = vrot.slane %v272_v0, 2 }
 0x164   : > { %v312_v9 = vrot.slane %v310_v43, 4  ;;  %v318_v13 = vrot.slane %v311_v4, 4  ;;  %v414_v15 = vsub.f32 %v412_v7, %v1218_v37  ;;  %v415_v20 = vsub.f32 %v413_v26, %v1215_v36 }
 0x165   : > { %v290_v21 = vadd.f32 %v289_v27, %v288_v60  ;;  %v296_v22 = vadd.f32 %v295_v6, %v294_v61  ;;  %v268_v23 = vadd.f32 %v267_v8, %v266_v63  ;;  %v274_v34 = vadd.f32 %v273_v52, %v272_v0  ;;  %v417_v32 = vpop.permute.xlu0 %416  ;;  %v419_v0 = vpop.permute.xlu1 %418 }
 0x166   : > { %v313_v35 = vadd.f32 %v312_v9, %v310_v43  ;;  %v319_v38 = vadd.f32 %v318_v13, %v311_v4  ;;  %v448_v18 = vmul.f32 %v414_v15, %v414_v15  ;;  %v449_v39 = vmul.f32 %v415_v20, %v415_v20 }
 0x167   : > { %v269_v40 = vrot.slane %v268_v23, 1  ;;  %v275_v42 = vrot.slane %v274_v34, 1  ;;  %v542_v55 = vrot.slane %v541_v57, 1  ;;  %v557_v56 = vsel %vm1314_vm5, %v1298_v17, 0.0 }
 0x168   : > { %v314_v49 = vrot.slane %v313_v35, 2  ;;  %v320_v51 = vrot.slane %v319_v38, 2  ;;  %v452_v30 = vadd.f32 %v448_v18, %v1288_v10  ;;  %v453_v50 = vadd.f32 %v449_v39, %v447_v25 }
 0x169   : > { %v270_v53 = vadd.f32 %v269_v40, %v268_v23  ;;  %v276_v54 = vadd.f32 %v275_v42, %v274_v34  ;;  %v297_v60 = vmul.f32 %v290_v21, %v277_v41  ;;  %v298_v61 = vmul.f32 %v296_v22, %v278_v46 }
 0x16a   : > { %v315_v63 = vadd.f32 %v314_v49, %v313_v35  ;;  %v321_v5 = vadd.f32 %v320_v51, %v319_v38  ;;  %v456_v2 = vrot.slane %v452_v30, 5  ;;  %v457_v10 = vrot.slane %v453_v50, 5 }
 0x16b   : > { %v548_v25 = vadd.f32 %v1280_v1, %v536_v45  ;;  %v558_v62 = vsel %vm1314_vm5, %v1310_v33, 0.0  ;;  %v279_v17 = vmul.f32 %v277_v41, %v270_v53  ;;  %v280_v43 = vmul.f32 %v278_v46, %v276_v54 }
 0x16c   : > { %v316_v4 = vrot.slane %v315_v63, 1  ;;  %v322_v7 = vrot.slane %v321_v5, 1  ;;  %v543_v26 = vadd.f32 %v542_v55, %v541_v57  ;;  %v561_v27 = vrot.slane %v557_v56, 1 }
 0x16d   : > { %v420_v6 = vsel %vm224_vm2, %v417_v32, %v419_v0  ;;  %v421_v1 = vsel %vm224_vm2, %v419_v0, %v417_v32  ;;  %v299_v8 = vmul.f32 4.6502977e-05, %v297_v60  ;;  %v300_v52 = vmul.f32 4.6502977e-05, %v298_v61 }
 0x16e   : > { %v317_v58 = vadd.f32 %v316_v4, %v315_v63  ;;  %v323_v33 = vadd.f32 %v322_v7, %v321_v5  ;;  %v460_v41 = vmul.f32 %v456_v2, %v324_v47  ;;  %v461_v24 = vmul.f32 %v457_v10, %v325_v48 }
 0x16f   : > { %v422_v46 = vsub.f32 %v420_v6, %v1218_v37  ;;  %v423_v57 = vsub.f32 %v421_v1, %v1215_v36  ;;  %v281_v9 = vmul.f32 4.6502977e-05, %v279_v17  ;;  %v282_v13 = vmul.f32 4.6502977e-05, %v280_v43 }
 0x170   : > { %v326_v19 = vmul.f32 %v324_v47, %v317_v58  ;;  %v327_v15 = vmul.f32 %v325_v48, %v323_v33  ;;  %v549_v20 = vadd.f32 %v1290_v12, %v543_v26  ;;  %v562_v21 = vrot.slane %v558_v62, 1 }
 0x171   : > { %v495_v22 = vmul.f32 %v422_v46, %v422_v46  ;;  %v496_v23 = vmul.f32 %v423_v57, %v423_v57  ;;  %v303_v34 = vrot.slane %v299_v8, 1  ;;  %v304_v35 = vrot.slane %v300_v52, 1 }
 0x172   : > { %v328_v38 = vmul.f32 9.259259e-05, %v326_v19  ;;  %v329_v18 = vmul.f32 9.259259e-05, %v327_v15  ;;  %v462_v37 = vmul.f32 9.259259e-05, %v460_v41  ;;  %v565_v53 = vadd.f32 %v561_v27, %v548_v25 }
 0x173   : > { %v463_v39 = vmul.f32 9.259259e-05, %v461_v24  ;;  %v499_v36 = vadd.f32 %v495_v22, %v1296_v16  ;;  %v500_v40 = vadd.f32 %v496_v23, %v1302_v29  ;;  %v307_v42 = vadd.f32 %v303_v34, %v281_v9  ;;  %v582_v27 = vld [vmem:[#allocation3] sm:$0x3] }
 0x174   : > { %v308_v47 = vadd.f32 %v304_v35, %v282_v13  ;;  %v332_v45 = vrot.slane %v328_v38, 2  ;;  %v333_v28 = vrot.slane %v329_v18, 2  ;;  %v964_v48 = vmov 1966171168  }
 0x175   : > { %v587_v49 = vunpack.c.l.s4 %v964_v48  ;;  %v505_v12 = vrot.slane %v499_v36, 4  ;;  %v506_v51 = vrot.slane %v500_v40, 4  ;;  %v566_v54 = vadd.f32 %v562_v21, %v549_v20 }
 0x176   : > { %v336_v30 = vadd.f32 %v332_v45, %v307_v42  ;;  %v337_v50 = vadd.f32 %v333_v28, %v308_v47  ;;  %v466_v55 = vrot.slane %v462_v37, 3  ;;  %v467_v56 = vrot.slane %v463_v39, 3 }
 0x177   : > { %v509_v60 = vmul.f32 %v505_v12, %v501_v59  ;;  %v510_v16 = vmul.f32 %v506_v51, %v502_v3  ;;  %v588_v32 = vunpack.c.0.s8 %v587_v49  ;;  %v567_v0 = vmul.f32 4.6502977e-05, %v565_v53 }
 0x178   : > { %v470_v29 = vadd.f32 %v466_v55, %v336_v30  ;;  %v471_v61 = vadd.f32 %v467_v56, %v337_v50  ;;  %v568_v2 = vmul.f32 4.6502977e-05, %v566_v54  ;;  %v615_v1 = vsub.s32 (!%p736_p5), 0, %v1159_v14 }
 0x179   : > { %v511_v63 = vmul.f32 9.259259e-05, %v509_v60  ;;  %v512_v5 = vmul.f32 9.259259e-05, %v510_v16  ;;  %v591_v43 = vsub.s32 %v588_v32, %v1159_v14 }
 0x17b   : > { %v515_v10 = vrot.slane %v511_v63, 4  ;;  %v516_v62 = vrot.slane %v512_v5, 4 }
 0x17d   : > { %v519_v17 = vadd.f32 %v515_v10, %v470_v29  ;;  %v520_v25 = vadd.f32 %v516_v62, %v471_v61 }
 0x17f   : > { %v569_v4 = vadd.f32 %v567_v0, %v519_v17  ;;  %v570_v7 = vadd.f32 %v568_v2, %v520_v25 }
 0x181   : > { %v585_v26 = vcombine.low %v569_v4, %v570_v7 }
 0x183   : > { %v592_v59 = vrot.slane %v585_v26, %v591_v43  ;;  %610 = sbr.rel (%p736_p5) target bundleno = 612 (0x264), region = 44 }
 0x185   : > { %v599_v44 = vrot.slane %v592_v59, %v591_v43 }
 0x187   : > { %v601_v3 = vadd.f32 %v599_v44, %v582_v27 }
 0x189   : > { %606 = vst.msk [vmem:[#allocation3] sm:$0x3] %vm604_vm6, %v601_v3 }
 0x190   : > { %v611_v6 = vld [vmem:[#allocation3] sm:$0x3] }
 0x191   : > { %v620_v8 = vrot.slane %v611_v6, %v1193_v31  ;;  %v616_v52 = vrot.slane %v611_v6, %v615_v1 }
 0x193   : > { %v625_v58 = vsel %vm623_vm7, %v620_v8, 0.0  ;;  %v624_v33 = vsel %vm623_vm7, %v616_v52, 0.0 }
 0x194   : > { %v626_v41 = vadd.f32 %v625_v58, %v624_v33 }
 0x196   : > { %627 = vadd.xlane.f32.xlu0 %v626_v41 }
 0x223   : > { %v628_v24 = vpop.xlane.xlu0 %627 }
 0x224   : > { %v629_v46 = vrot.slane %v628_v24, 4 }
 0x226   : > { %v630_v11 = vadd.f32 %v629_v46, %v628_v24 }
 0x228   : > { %v631_v57 = vrot.slane %v630_v11, 2 }
 0x22a   : > { %v632_v9 = vadd.f32 %v631_v57, %v630_v11 }
 0x22c   : > { %v633_v13 = vrot.slane %v632_v9, 1 }
 0x22e   : > { %v634_v19 = vadd.f32 %v633_v13, %v632_v9 }
 0x230   : > { %739 = vpush %v634_v19 }
 0x261   : > { %s740_s12 = spop %739 }
 0x262   : > { %v636_v14 = vstv %s740_s12 }
 0x263   : > { %638 = vst.msk [vmem:[%s186_s30] sm:$0x1] %vm637_vm8, %v636_v14 }
 0x264 PF: > { %s16_s16 = sadd.s32 1, %s956_s16   ;;  %s1416_s9 = smov %s932_s10 }
 0x265   : > { %p13_p9 = scmp.ge.s32.totalorder %s16_s16, 14   ;;  %s1417_s10 = smov %s936_s11 }
 0x266   : > { %s1418_s11 = smov %s1084_s3  ;;  %s1419_s12 = smov %s948_s14 }
 0x267   : > { %s1420_s13 = smov %s952_s15  ;;  %s1421_s14 = smov %s1424_s24 }
 0x268   : > { %s1422_s15 = smov %s1428_s7  ;;  %15 = sbr.rel (!%p13_p9) target bundleno = 8 (0x8), region = 80 }
 0x26f   :  { %656 = vsyncpa [#allocation5], 1 }
 0x270   :  { %658 = vsyncpa [#allocation5 + $0x1], 1 }
 0x271   :  { %659 = vsyncpa [#allocation7], 1 }

</bundles_post_ra>
